<compile_context>
chip_gen: v6e
topology: v6e:2x2x1
jax: 0.10.0
libtpu: 0.0.40
codegen_flags: <defaults>
</compile_context>

<pallas_src>
import jax
import jax.numpy as jnp
from jax.experimental import pallas as pl
from jax.experimental.pallas import tpu as pltpu


_USE_TPU_PRNG = jax.default_backend() == "tpu"


def _tln_dropout_kernel_tpu(seed_ref, thresh_ref, x_ref, o_ref):
    # Seed with (base_seed, tile_index) as separate words: tiles (and both
    # TensorCores under "parallel" semantics) get independent streams, and
    # consecutive calls with nearby base seeds do not alias tile streams.
    pltpu.prng_seed(seed_ref[0], pl.program_id(0))
    bits = pltpu.bitcast(pltpu.prng_random_bits(x_ref.shape), jnp.uint32)
    keep = bits < thresh_ref[0]
    x = x_ref[...]
    o_ref[...] = jnp.where(keep, x, jnp.zeros_like(x))


def _tln_dropout_kernel_hash(seed_ref, thresh_ref, x_ref, o_ref):
    # Portable counter-based PRNG (splitmix32-style) keyed on the *global*
    # element index: grid-invariant and tile-independent by construction.
    # (int32 index wraps for >2^31 elements; irrelevant for TPU execution.)
    rows, cols = x_ref.shape
    r = jax.lax.broadcasted_iota(jnp.int32, (rows, cols), 0)
    c = jax.lax.broadcasted_iota(jnp.int32, (rows, cols), 1)
    idx = (pl.program_id(0) * rows + r) * cols + c
    z = idx.astype(jnp.uint32) + seed_ref[0].astype(jnp.uint32)
    z = z ^ (z >> 16)
    z = z * jnp.uint32(0x7FEB352D)
    z = z ^ (z >> 15)
    z = z * jnp.uint32(0x846CA68B)
    z = z ^ (z >> 16)
    keep = z < thresh_ref[0]
    x = x_ref[...]
    o_ref[...] = jnp.where(keep, x, jnp.zeros_like(x))


def _sublane(dtype):
    # bf16/fp16 pack two rows per sublane -> row tiles must be multiples of 16.
    return 16 if jnp.dtype(dtype).itemsize == 2 else 8


def _choose_cols(n, sub):
    """Pick a lane-dense column width (multiple of 128) for the flat slab."""
    candidates = (4096, 2048, 1024, 512, 256, 128)
    divisors = [c for c in candidates if n % c == 0]
    # Prefer a width that leaves enough rows (>= 2 sublane-aligned tiles) to
    # split the grid across both v7x TensorCores.
    for c in divisors:
        if n // c >= 2 * sub:
            return c, 0
    if divisors:
        return divisors[0], 0
    # No candidate divides numel: pad the flat tail (<= 511 extra elements).
    c = 512
    return c, (-n) % c


def _vmem_budget():
    """(per-tile byte cap, vmem_limit_bytes) based on physical VMEM size."""
    try:
        cap = pltpu.get_tpu_info().vmem_capacity_bytes
    except Exception:
        cap = 128 * 1024 * 1024
    if cap <= 64 * 1024 * 1024:
        # v7x: 64 MiB per TensorCore -> keep headroom for 2x(in+out) buffers
        # plus the uint32 random-bits / compare intermediates.
        return 4 * 1024 * 1024, 40 * 1024 * 1024
    # v5e / v6e: 128 MiB physical VMEM.
    return 8 * 1024 * 1024, 64 * 1024 * 1024


def tln_dropout(x, logit_posterior_mean, seed, *, block_rows=None):
    """Forward pass of TLNDropout: x * Bernoulli(sigmoid(logit_posterior_mean))."""
    orig_shape = x.shape
    n = int(x.size)
    dtype = x.dtype
    itemsize = jnp.dtype(dtype).itemsize
    sub = _sublane(dtype)

    cols, pad = _choose_cols(n, sub)
    flat = x.reshape(-1)
    if pad:
        flat = jnp.pad(flat, (0, pad))
    rows = (n + pad) // cols
    x2 = flat.reshape(rows, cols)  # lane-dense 2-D slab [rows, C], C % 128 == 0

    tile_cap_bytes, vmem_limit = _vmem_budget()

    if block_rows is None:
        br = max(sub, (tile_cap_bytes // (itemsize * cols)) // sub * sub)
        block_rows = int(min(rows, br))
        # Guarantee >= 2 grid steps when there is enough data so v7x's two
        # TensorCores both get work (single-step grids run on one TC only).
        if block_rows >= rows and rows >= 2 * sub:
            half = -(-rows // 2)                        # ceil(rows / 2)
            block_rows = int(-(-half // sub) * sub)     # round up to sublane
    else:
        block_rows = int(min(block_rows, rows))
        if block_rows < rows and block_rows % sub:
            block_rows = int(-(-block_rows // sub) * sub)  # (8,128) constraint

    grid = (pl.cdiv(rows, block_rows),)

    # Keep-probability -> uint32 threshold (mask = bits < thresh).
    p = jax.nn.sigmoid(jnp.asarray(logit_posterior_mean, jnp.float32))
    thresh = jnp.minimum(
        jnp.floor(p * jnp.float32(4294967296.0)), jnp.float32(4294967295.0)
    ).astype(jnp.uint32)
    thresh_arr = jnp.reshape(thresh, (1,))
    seed_arr = jnp.asarray([seed], dtype=jnp.int32)

    if _USE_TPU_PRNG:
        kernel = _tln_dropout_kernel_tpu
        compiler_params = pltpu.CompilerParams(
            dimension_semantics=("parallel",),
            vmem_limit_bytes=vmem_limit,
        )
    else:
        kernel = _tln_dropout_kernel_hash
        compiler_params = None

    out2 = pl.pallas_call(
        kernel,
        out_shape=jax.ShapeDtypeStruct((rows, cols), dtype),
        grid=grid,
        in_specs=[
            pl.BlockSpec(memory_space=pltpu.MemorySpace.SMEM),   # seed scalar
            pl.BlockSpec(memory_space=pltpu.MemorySpace.SMEM),   # uint32 threshold
            pl.BlockSpec((block_rows, cols), lambda i: (i, 0)),  # x row tile
        ],
        out_specs=pl.BlockSpec((block_rows, cols), lambda i: (i, 0)),
        compiler_params=compiler_params,
        # NOTE: pass input_output_aliases={2: 0} here if the caller can donate
        # x (removes an HBM allocation; bytes moved are unchanged).
    )(seed_arr, thresh_arr, x2)

    out_flat = out2.reshape(-1)
    if pad:
        out_flat = out_flat[:n]
    return out_flat.reshape(orig_shape)


if __name__ == "__main__":
    key = jax.random.PRNGKey(0)

    # Dropout acts on [batch, hidden] fully-connected activations.  hidden=200
    # is NOT a multiple of 128, exercising the flatten-to-lane-dense path
    # (numel=12800 -> C=512, rows=25 -> 2 grid steps with a partial last tile).
    batch, hidden = 64, 200
    x = jax.random.normal(key, (batch, hidden), dtype=jnp.float32)

    # Deterministic parameter init, matching the module's __init__:
    # rate = 0.5  ->  logit_posterior_mean = -log(1/(1-rate) - 1) = 0.0
    rate = 0.5
    logit_posterior_mean = jnp.asarray(
        -jnp.log(1.0 / (1.0 - rate) - 1.0), dtype=jnp.float32
    )

    out = tln_dropout(x, logit_posterior_mean, seed=1234)
    jax.block_until_ready(out)

    # Sanity: every output entry is either 0 or exactly x (mask is {0,1}),
    # and the keep fraction is near p = 0.5.
    keep_or_zero = jnp.logical_or(out == 0.0, out == x)
    keep_frac = float(jnp.mean((out != 0.0).astype(jnp.float32)))
    ok = (
        out.shape == x.shape
        and out.dtype == x.dtype
        and bool(jnp.all(keep_or_zero))
        and 0.4 < keep_frac < 0.6
    )
    assert ok, "TLNDropout kernel produced unexpected values"
    print("KERNEL_OK")
</pallas_src>

<mosaic_0001>
module attributes {stable_mosaic.version = 11 : i64} {
  func.func @_tln_dropout_kernel_hash(%arg0: i32, %arg1: memref<1xi32, #tpu.memory_space<smem>>, %arg2: memref<1xi32, #tpu.memory_space<smem>>, %arg3: memref<16x512xf32, #tpu.memory_space<vmem>>, %arg4: memref<16x512xf32, #tpu.memory_space<vmem>>) attributes {dimension_semantics = [#tpu.dimension_semantics<arbitrary>], iteration_bounds = array<i64: 2>, scalar_prefetch = 0 : i64, scratch_operands = 0 : i64, tpu.core_type = #tpu.core_type<tc>, window_params = [{transform_indices = @transform_0, window_bounds = array<i64: 1>}, {transform_indices = @transform_1, window_bounds = array<i64: 1>}, {transform_indices = @transform_2, window_bounds = array<i64: 16, 512>}, {transform_indices = @transform_3, window_bounds = array<i64: 16, 512>}]} {
    %0 = tpu.iota {dimensions = array<i32: 0>} : vector<16x512xi32>
    %1 = tpu.iota {dimensions = array<i32: 1>} : vector<16x512xi32>
    %c16_i32 = arith.constant 16 : i32
    %2 = arith.muli %arg0, %c16_i32 : i32
    %3 = vector.broadcast %2 : i32 to vector<16x512xi32>
    %4 = arith.addi %3, %0 : vector<16x512xi32>
    %c512_i32 = arith.constant 512 : i32
    %5 = vector.broadcast %c512_i32 : i32 to vector<16x512xi32>
    %6 = arith.muli %4, %5 : vector<16x512xi32>
    %7 = arith.addi %6, %1 : vector<16x512xi32>
    %c0 = arith.constant 0 : index
    %8 = memref.load %arg1[%c0] : memref<1xi32, #tpu.memory_space<smem>>
    %9 = vector.broadcast %8 : i32 to vector<16x512xi32>
    %10 = arith.addi %7, %9 : vector<16x512xi32>
    %c16_i32_0 = arith.constant 16 : i32
    %11 = vector.broadcast %c16_i32_0 : i32 to vector<16x512xi32>
    %12 = arith.shrui %10, %11 : vector<16x512xi32>
    %13 = arith.xori %10, %12 : vector<16x512xi32>
    %c2146121005_i32 = arith.constant 2146121005 : i32
    %14 = vector.broadcast %c2146121005_i32 : i32 to vector<16x512xi32>
    %15 = arith.muli %13, %14 : vector<16x512xi32>
    %c15_i32 = arith.constant 15 : i32
    %16 = vector.broadcast %c15_i32 : i32 to vector<16x512xi32>
    %17 = arith.shrui %15, %16 : vector<16x512xi32>
    %18 = arith.xori %15, %17 : vector<16x512xi32>
    %c-2073254261_i32 = arith.constant -2073254261 : i32
    %19 = vector.broadcast %c-2073254261_i32 : i32 to vector<16x512xi32>
    %20 = arith.muli %18, %19 : vector<16x512xi32>
    %c16_i32_1 = arith.constant 16 : i32
    %21 = vector.broadcast %c16_i32_1 : i32 to vector<16x512xi32>
    %22 = arith.shrui %20, %21 : vector<16x512xi32>
    %23 = arith.xori %20, %22 : vector<16x512xi32>
    %c0_2 = arith.constant 0 : index
    %24 = memref.load %arg2[%c0_2] : memref<1xi32, #tpu.memory_space<smem>>
    %25 = vector.broadcast %24 : i32 to vector<16x512xi32>
    %26 = arith.cmpi ult, %23, %25 : vector<16x512xi32>
    %c0_3 = arith.constant 0 : index
    %c0_4 = arith.constant 0 : index
    %27 = vector.load %arg3[%c0_3, %c0_4] : memref<16x512xf32, #tpu.memory_space<vmem>>, vector<16x512xf32>
    %cst = arith.constant 0.000000e+00 : f32
    %28 = vector.broadcast %cst : f32 to vector<16x512xf32>
    %29 = arith.select %26, %27, %28 : vector<16x512xi1>, vector<16x512xf32>
    %c0_5 = arith.constant 0 : index
    %c0_6 = arith.constant 0 : index
    %30 = vector.load %arg4[%c0_5, %c0_6] : memref<16x512xf32, #tpu.memory_space<vmem>>, vector<16x512xf32>
    tpu.vector_store %arg4[%c0_5, %c0_6], %29 {strides = array<i32>} : memref<16x512xf32, #tpu.memory_space<vmem>>, vector<16x512xf32>,
    return
  }
  func.func @transform_0(%arg0: i32) -> i32 {
    %c0_i32 = arith.constant 0 : i32
    %c0_i32_0 = arith.constant 0 : i32
    return %c0_i32 : i32
  }
  func.func @transform_1(%arg0: i32) -> i32 {
    %c0_i32 = arith.constant 0 : i32
    %c0_i32_0 = arith.constant 0 : i32
    return %c0_i32 : i32
  }
  func.func @transform_2(%arg0: i32) -> (i32, i32) {
    %c0_i32 = arith.constant 0 : i32
    %c0_i32_0 = arith.constant 0 : i32
    return %arg0, %c0_i32 : i32, i32
  }
  func.func @transform_3(%arg0: i32) -> (i32, i32) {
    %c0_i32 = arith.constant 0 : i32
    %c0_i32_0 = arith.constant 0 : i32
    return %arg0, %c0_i32 : i32, i32
  }
}

</mosaic_0001>

<bundles_post_ra>
// kernel: tpu_custom_call.1
= control target key start
LH: loop header
LB: loop body
LE: loop exit
PB: predicated region body
PF: predicated region fallthrough
CT: control target
= control target key end

     0   :  { %s799_s0 = inlined_call_operand.<no memory space> [shape: s32[1], index: 0, kind: input, shape index: {}]   ;;  %s800_s1 = inlined_call_operand.<no memory space> [shape: u32[1], index: 1, kind: input, shape index: {}]   ;;  %s801_s2 = inlined_call_operand.hbm [shape: f32[25,512], index: 2, kind: input, shape index: {}]   ;;  %s802_s3 = inlined_call_operand.hbm [shape: f32[25,512], index: 3, kind: output, shape index: {}]  }
   0x1   :  { %8 = sst [smem:[#allocation2]] %s799_s0 }
   0x2   :  { %9 = sst [smem:[#allocation3]] %s800_s1 }
   0x3   :  { %10 = vsyncpa [#allocation5], 0 }
   0x4   :  { %12 = vsyncpa [#allocation5 + $0x1], 0 }
   0x5   :  { %13 = vsyncpa [#allocation6], 0 }
   0x6   :  { %15 = vsyncpa [#allocation6 + $0x1], 0  ;;  %s609_s16 = smov 0   ;;  %s611_s17 = smov 0  }
   0x7   :  { %s613_s18 = smov 0   ;;  %s615_s19 = smov 0  }
   0x8 LB: > { %s630_s0 = sadd.s32 4294967295, %s575_s19   ;;  %s412_s1 = sadd.s32 4294967294, %s575_s19   ;;  %s575_s19 = sphi %s615_s19, %s817_s19   ;;  %s571_s18 = sphi %s613_s18, %s816_s18   ;;  %s567_s17 = sphi %s611_s17, %s815_s17   ;;  %s563_s16 = sphi %s609_s16, %s814_s16  }
   0x9   : > { %s634_s20 = sadd.s32 1, %s575_s19   ;;  %s70_s21 = sadd.s32 1, %s571_s18 }
   0xa   : > { %s67_s22 = ssub.s32 %s575_s19, %s634_s20  ;;  %p77_p0 = scmp.ne.s32.totalorder %s571_s18, %s567_s17 }
   0xb   : > { %p68_p1 = scmp.eq.s32.totalorder %s67_s22, 0  ;;  %p78_p2 = scmp.eq.s32.totalorder %s575_s19, 0 }
   0xc   : > { %p83_p3 = scmp.ne.s32.totalorder %s567_s17, %s563_s16  ;;  %p84_p4 = scmp.eq.s32.totalorder %s630_s0, 0 }
   0xd   : > { %s646_s23 = scalar_select %p68_p1, %s571_s18, %s70_s21  }
   0xe   : > { %p648_p5 = por %p78_p2, %p77_p0  ;;  %p652_p6 = por %p84_p4, %p83_p3 }
   0xf   : > { %p107_p7 = scmp.eq.s32.totalorder %s630_s0, 1  ;;  %p113_p8 = scmp.eq.s32.totalorder %s412_s1, 1 }
  0x10   : > { %s806_s25 = scalar_select %p652_p6, 1, 0 }
  0x11   : > { %p445_p10 = scmp.lt.s32.totalorder %s575_s19, 2  ;;  %p659_p11 = por %p107_p7, %p77_p0 }
  0x12   : > { %p663_p12 = por %p113_p8, %p83_p3  ;;  %s139_s28 = sand.u32 1, %s571_s18  }
  0x13   : > { %s807_s26 = scalar_select %p659_p11, 1, 0 }
  0x14   : > { %s808_s27 = scalar_select %p663_p12, 1, 0 }
  0x15   : > { %s430_s29 = sshll.u32 %s575_s19, 10  ;;  %s415_s30 = sshll.u32 %s139_s28, 6 }
  0x16   : > { %s672_s6 = scalar_lea.hbm %s801_s2, %s430_s29  ;;  %s143_s7 = scalar_lea.vmem [#allocation4], %s415_s30 }
  0x17   : > { %s151_s8 = sshll.u32 %s143_s7, 4  ;;  %p676_p13 = pnand %p445_p10, %p648_p5  ;;  %s680_s8 = int_to_ptr.vmem [resolvable:$true] %s151_s8 }
  0x18   : > { %s682_s10 = scalar_lea.sflag [#allocation5], %s139_s28  ;;  %s483_s11 = scalar_lea.hbm %s672_s6, 1024 }
  0x19   : > { %p484_p0 = scmp.ne.s32.totalorder %s672_s6, %s483_s11  ;;  %p485_p1 = pneg %p676_p13 }
  0x1a   : > { %s488_s14 = scalar_lea.hbm %s801_s2, 2048  ;;  %p489_p4 = scmp.lt.s32.totalorder %s672_s6, %s801_s2 }
  0x1b   : > { %p486_p2 = pnand %p485_p1, %p484_p0  ;;  %p490_p5 = scmp.lt.s32.totalorder %s488_s14, %s483_s11 }
  0x1d   : > { %p487_p3 = pneg %p486_p2  ;;  %p491_p7 = por %p490_p5, %p489_p4 }
  0x1f   : > { %p492_p8 = pnand %p491_p7, %p487_p3 }
  0x21   : > { %495 = shalt.err (!%p492_p8)
}
  0x22   : > { %s496_s21 = scalar_lea.vmem %s680_s8, 1024  ;;  %s577_s22 = smov [#allocation4]  }
  0x23   : > { %p497_p10 = scmp.ne.s32.totalorder %s680_s8, %s496_s21  ;;  %s501_s24 = sshll.u32 %s577_s22, 4  ;;  %s502_s24 = int_to_ptr.vmem [resolvable:$false] %s501_s24 }
  0x24   : > { %s503_s28 = scalar_lea.vmem %s502_s24, 2048  ;;  %p504_p2 = scmp.lt.s32.totalorder %s680_s8, %s502_s24 }
  0x25   : > { %p499_p9 = pnand %p497_p10, %p485_p1  ;;  %p505_p12 = scmp.lt.s32.totalorder %s503_s28, %s496_s21 }
  0x27   : > { %p500_p0 = pneg %p499_p9  ;;  %p506_p11 = por %p505_p12, %p504_p2 }
  0x29   : > { %p507_p6 = pnand %p506_p11, %p500_p0 }
  0x2b   : > { %510 = shalt.err (!%p507_p6)
}
  0x2c   : > { %s578_s29 = smov 512   ;;  %s579_s30 = smov 32  }
  0x2d   : > { %440 = dma.hbm_to_vmem [thread:$0]  (!%p676_p13), %s672_s6, 1024, %s680_s8, %s682_s10, %s578_s29, %s578_s29, %s579_s30  }
  0x2e   : > { %p419_p9 = scmp.ge.s32.totalorder %s575_s19, 1  ;;  %p159_p1 = scmp.lt.s32.totalorder %s575_s19, 3 }
  0x30   : > { %p160_p3 = pnand %p419_p9, %p159_p1 }
  0x31   : > { %s706_s4 = sand.u32 (!%p160_p3), 1, %s567_s17   ;;  %p810_p6 = scmp.ne.s32.totalorder (!%p160_p3), %s806_s25, 0 }
  0x32   : > { %163 = sbr.rel (%p160_p3) target bundleno = 105 (0x69), region = 32  ;;  %s420_s5 = sshll.u32 (!%p160_p3), %s706_s4, 6 }
  0x33   : > { %s166_s7 = scalar_lea.sflag (!%p160_p3), [#allocation5], %s706_s4  ;;  %s712_s11 = scalar_lea.vmem (!%p160_p3), [#allocation4], %s420_s5 }
  0x37   : > { %554 = dma.done.wait (%p810_p6), %s166_s7, 1024  }
  0x38   : > { %556 = vsyncadd (%p810_p6), %s166_s7, 4294966272  ;;  %v194_v0 = vlaneseq  ;;  %s422_s6 = sshll.u32 %s630_s0, 4  ;;  %s216_s8 = sld [smem:[#allocation2]] }
  0x39   : > { %v203_v1 = vstv %s422_s6  ;;  %s290_s9 = sld [smem:[#allocation3]]  ;;  %s728_s25 = scalar_lea.vmem [#allocation7], %s420_s5 }
  0x3a   : > { %v195_v2 = vshrl.u32 %v194_v0, 7  ;;  %v198_v3 = vand.u32 127, %v194_v0  ;;  %s339_s10 = sshll.u32 %s728_s25, 4  ;;  %s432_s12 = sshll.u32 %s630_s0, 10  ;;  %s739_s10 = int_to_ptr.vmem [resolvable:$true] %s339_s10 }
  0x3b   : > { %s750_s14 = scalar_lea.hbm %s802_s3, %s432_s12  ;;  %s325_s15 = scalar_lea.sflag [#allocation6], %s706_s4 }
  0x3c   : > { %v204_v4 = vadd.s32 %v203_v1, %v195_v2  ;;  %v199_v5 = vadd.s32 128, %v198_v3  ;;  %v200_v6 = vadd.s32 256, %v198_v3  ;;  %v201_v7 = vadd.s32 384, %v198_v3  ;;  %s511_s1 = scalar_lea.vmem %s739_s10, 1024  ;;  %p811_p12 = scmp.ne.s32.totalorder %s807_s26, 0 }
  0x3d   : > { %v196_v8 = vadd.s32 8, %v195_v2  ;;  %p512_p11 = scmp.ne.s32.totalorder %s739_s10, %s511_s1  ;;  %s580_s21 = smov [#allocation7]  }
  0x3e   : > { %v206_v9 = vmul.u32 512, %v204_v4  ;;  %v217_v10 = vstv %s216_s8  ;;  %s515_s22 = sshll.u32 %s580_s21, 4  ;;  %s516_s22 = int_to_ptr.vmem [resolvable:$false] %s515_s22 }
  0x3f   : > { %v205_v11 = vadd.s32 %v203_v1, %v196_v8  ;;  %v719_v41 = vstv %s290_s9  ;;  %p513_p13 = pnand %p512_p11, %p811_p12  ;;  %s517_s24 = scalar_lea.vmem %s516_s22, 2048 }
  0x40   : > { %v208_v12 = vadd.s32 %v206_v9, %v198_v3  ;;  %v209_v13 = vadd.s32 %v206_v9, %v199_v5  ;;  %v210_v14 = vadd.s32 %v206_v9, %v200_v6  ;;  %v211_v15 = vadd.s32 %v206_v9, %v201_v7  ;;  %p518_p5 = scmp.lt.s32.totalorder %s739_s10, %s516_s22  ;;  %p519_p7 = scmp.lt.s32.totalorder %s517_s24, %s511_s1 }
  0x41   : > { %v207_v16 = vmul.u32 512, %v205_v11  ;;  %p514_p4 = pneg %p513_p13 }
  0x42   : > { %v218_v17 = vadd.s32 %v217_v10, %v208_v12  ;;  %v219_v18 = vadd.s32 %v217_v10, %v209_v13  ;;  %v220_v19 = vadd.s32 %v217_v10, %v210_v14  ;;  %v221_v20 = vadd.s32 %v217_v10, %v211_v15  ;;  %p520_p8 = por %p519_p7, %p518_p5 }
  0x43   : > { %v212_v21 = vadd.s32 %v207_v16, %v198_v3  ;;  %v213_v22 = vadd.s32 %v207_v16, %v199_v5  ;;  %v214_v23 = vadd.s32 %v207_v16, %v200_v6  ;;  %v215_v27 = vadd.s32 %v207_v16, %v201_v7 }
  0x44   : > { %v226_v24 = vshrl.u32 %v218_v17, 16  ;;  %v227_v25 = vshrl.u32 %v219_v18, 16  ;;  %v228_v26 = vshrl.u32 %v220_v19, 16  ;;  %v229_v28 = vshrl.u32 %v221_v20, 16  ;;  %p521_p10 = pnand %p520_p8, %p514_p4 }
  0x45   : > { %v222_v29 = vadd.s32 %v217_v10, %v212_v21  ;;  %v223_v30 = vadd.s32 %v217_v10, %v213_v22  ;;  %v224_v31 = vadd.s32 %v217_v10, %v214_v23  ;;  %v225_v35 = vadd.s32 %v217_v10, %v215_v27  ;;  %v302_v23 = vld [vmem:[%s712_s11 + $0x10] sm:$0xff] }
  0x46   : > { %v234_v32 = vxor.u32 %v226_v24, %v218_v17  ;;  %v235_v33 = vxor.u32 %v227_v25, %v219_v18  ;;  %v236_v34 = vxor.u32 %v228_v26, %v220_v19  ;;  %v237_v36 = vxor.u32 %v229_v28, %v221_v20  ;;  %v300_v17 = vld [vmem:[%s712_s11] sm:$0xff]  ;;  %v301_v19 = vld [vmem:[%s712_s11 + $0x8] sm:$0xff]  ;;  %v303_v25 = vld [vmem:[%s712_s11 + $0x18] sm:$0xff] }
  0x47   : > { %v230_v37 = vshrl.u32 %v222_v29, 16  ;;  %v231_v38 = vshrl.u32 %v223_v30, 16  ;;  %v232_v39 = vshrl.u32 %v224_v31, 16  ;;  %v233_v43 = vshrl.u32 %v225_v35, 16 }
  0x48   : > { %v242_v40 = vmul.u32 2146121005, %v234_v32  ;;  %v243_v42 = vmul.u32 2146121005, %v235_v33 }
  0x49   : > { %v244_v44 = vmul.u32 2146121005, %v236_v34  ;;  %v245_v45 = vmul.u32 2146121005, %v237_v36  ;;  %v238_v46 = vxor.u32 %v230_v37, %v222_v29  ;;  %v239_v47 = vxor.u32 %v231_v38, %v223_v30  ;;  %v305_v37 = vld [vmem:[%s712_s11 + $0x28] sm:$0xff] }
  0x4a   : > { %v250_v48 = vshrl.u32 %v242_v40, 15  ;;  %v251_v49 = vshrl.u32 %v243_v42, 15  ;;  %v240_v50 = vxor.u32 %v232_v39, %v224_v31  ;;  %v241_v51 = vxor.u32 %v233_v43, %v225_v35  ;;  %v304_v35 = vld [vmem:[%s712_s11 + $0x20] sm:$0xff]  ;;  %v306_v39 = vld [vmem:[%s712_s11 + $0x30] sm:$0xff] }
  0x4b   : > { %v252_v52 = vshrl.u32 %v244_v44, 15  ;;  %v253_v53 = vshrl.u32 %v245_v45, 15  ;;  %v246_v54 = vmul.u32 2146121005, %v238_v46  ;;  %v247_v55 = vmul.u32 2146121005, %v239_v47 }
  0x4c   : > { %v258_v56 = vxor.u32 %v250_v48, %v242_v40  ;;  %v259_v57 = vxor.u32 %v251_v49, %v243_v42  ;;  %v248_v58 = vmul.u32 2146121005, %v240_v50  ;;  %v249_v59 = vmul.u32 2146121005, %v241_v51  ;;  %v307_v42 = vld [vmem:[%s712_s11 + $0x38] sm:$0xff] }
  0x4d   : > { %v260_v60 = vxor.u32 %v252_v52, %v244_v44  ;;  %v261_v61 = vxor.u32 %v253_v53, %v245_v45  ;;  %v254_v62 = vshrl.u32 %v246_v54, 15  ;;  %v255_v63 = vshrl.u32 %v247_v55, 15 }
  0x4e   : > { %v266_v0 = vmul.u32 2221713035, %v258_v56  ;;  %v267_v1 = vmul.u32 2221713035, %v259_v57  ;;  %v256_v2 = vshrl.u32 %v248_v58, 15  ;;  %v257_v3 = vshrl.u32 %v249_v59, 15 }
  0x4f   : > { %v268_v4 = vmul.u32 2221713035, %v260_v60  ;;  %v269_v5 = vmul.u32 2221713035, %v261_v61  ;;  %v262_v6 = vxor.u32 %v254_v62, %v246_v54  ;;  %v263_v7 = vxor.u32 %v255_v63, %v247_v55 }
  0x50   : > { %v274_v8 = vshrl.u32 %v266_v0, 16  ;;  %v275_v9 = vshrl.u32 %v267_v1, 16  ;;  %v264_v10 = vxor.u32 %v256_v2, %v248_v58  ;;  %v265_v11 = vxor.u32 %v257_v3, %v249_v59 }
  0x51   : > { %v276_v12 = vshrl.u32 %v268_v4, 16  ;;  %v277_v13 = vshrl.u32 %v269_v5, 16  ;;  %v270_v14 = vmul.u32 2221713035, %v262_v6  ;;  %v271_v15 = vmul.u32 2221713035, %v263_v7 }
  0x52   : > { %v282_v16 = vxor.u32 %v274_v8, %v266_v0  ;;  %v283_v18 = vxor.u32 %v275_v9, %v267_v1  ;;  %v272_v20 = vmul.u32 2221713035, %v264_v10  ;;  %v273_v21 = vmul.u32 2221713035, %v265_v11 }
  0x53   : > { %v284_v22 = vxor.u32 %v276_v12, %v268_v4  ;;  %v285_v24 = vxor.u32 %v277_v13, %v269_v5  ;;  %v278_v26 = vshrl.u32 %v270_v14, 16  ;;  %v279_v27 = vshrl.u32 %v271_v15, 16 }
  0x54   : > { %vm292_vm0 = vcmp.lt.u32.totalorder %v282_v16, %v719_v41  ;;  %vm293_vm1 = vcmp.lt.u32.totalorder %v283_v18, %v719_v41  ;;  %v280_v28 = vshrl.u32 %v272_v20, 16  ;;  %v281_v29 = vshrl.u32 %v273_v21, 16 }
  0x55   : > { %v308_v30 = vsel %vm292_vm0, %v300_v17, 0.0  ;;  %v309_v31 = vsel %vm293_vm1, %v301_v19, 0.0  ;;  %vm294_vm2 = vcmp.lt.u32.totalorder %v284_v22, %v719_v41  ;;  %vm295_vm3 = vcmp.lt.u32.totalorder %v285_v24, %v719_v41 }
  0x56   : > { %316 = vst [vmem:[%s728_s25] sm:$0xff] %v308_v30  ;;  %317 = vst [vmem:[%s728_s25 + $0x8] sm:$0xff] %v309_v31  ;;  %v310_v32 = vsel %vm294_vm2, %v302_v23, 0.0  ;;  %v311_v33 = vsel %vm295_vm3, %v303_v25, 0.0  ;;  %v286_v34 = vxor.u32 %v278_v26, %v270_v14  ;;  %v287_v36 = vxor.u32 %v279_v27, %v271_v15 }
  0x57   : > { %318 = vst [vmem:[%s728_s25 + $0x10] sm:$0xff] %v310_v32  ;;  %319 = vst [vmem:[%s728_s25 + $0x18] sm:$0xff] %v311_v33  ;;  %v288_v38 = vxor.u32 %v280_v28, %v272_v20  ;;  %v289_v40 = vxor.u32 %v281_v29, %v273_v21 }
  0x58   : > { %vm296_vm4 = vcmp.lt.u32.totalorder %v286_v34, %v719_v41  ;;  %vm297_vm5 = vcmp.lt.u32.totalorder %v287_v36, %v719_v41 }
  0x59   : > { %v312_v43 = vsel %vm296_vm4, %v304_v35, 0.0  ;;  %v313_v44 = vsel %vm297_vm5, %v305_v37, 0.0  ;;  %vm298_vm6 = vcmp.lt.u32.totalorder %v288_v38, %v719_v41  ;;  %vm299_vm7 = vcmp.lt.u32.totalorder %v289_v40, %v719_v41 }
  0x5a   : > { %320 = vst [vmem:[%s728_s25 + $0x20] sm:$0xff] %v312_v43  ;;  %321 = vst [vmem:[%s728_s25 + $0x28] sm:$0xff] %v313_v44  ;;  %v314_v45 = vsel %vm298_vm6, %v306_v39, 0.0  ;;  %v315_v46 = vsel %vm299_vm7, %v307_v42, 0.0 }
  0x5b   : > { %322 = vst [vmem:[%s728_s25 + $0x30] sm:$0xff] %v314_v45  ;;  %323 = vst [vmem:[%s728_s25 + $0x38] sm:$0xff] %v315_v46 }
  0x5c   : > { %524 = shalt.err (!%p521_p10)
}
  0x5d   : > { %s525_s28 = scalar_lea.hbm %s750_s14, 1024  ;;  %s529_s5 = scalar_lea.hbm %s802_s3, 2048 }
  0x5e   : > { %p526_p0 = scmp.ne.s32.totalorder %s750_s14, %s525_s28  ;;  %p530_p1 = scmp.lt.s32.totalorder %s750_s14, %s802_s3 }
  0x5f   : > { %p531_p3 = scmp.lt.s32.totalorder %s529_s5, %s525_s28 }
  0x60   : > { %p527_p2 = pnand %p526_p0, %p811_p12 }
  0x61   : > { %p532_p6 = por %p531_p3, %p530_p1 }
  0x62   : > { %p528_p9 = pneg %p527_p2 }
  0x64   : > { %p533_p11 = pnand %p532_p6, %p528_p9 }
  0x66   : > { %536 = shalt.err (!%p533_p11)
}
  0x67   : > { %s581_s6 = smov 512   ;;  %s582_s8 = smov 32  }
  0x68   : > { %435 = dma.vmem_to_hbm [thread:$0]  (%p811_p12), %s739_s10, 1024, %s750_s14, %s325_s15, %s581_s6, %s581_s6, %s582_s8  }
  0x69 PF: > { %s354_s9 = sand.u32 1, %s563_s16   ;;  %p812_p13 = scmp.ne.s32.totalorder %s808_s27, 0 }
  0x6a   : > { %p813_p4 = scmp.ge.s32.totalorder %s575_s19, 2  ;;  %s355_s25 = scalar_lea.sflag [#allocation6], %s354_s9 }
  0x6c   : > { %p442_p5 = pnand %p813_p4, %p812_p13 }
  0x6e   : > { %p443_p7 = pneg %p442_p5 }
  0x70   : > { %558 = dma.done.wait (%p443_p7), %s355_s25, 1024  }
  0x71   : > { %560 = vsyncadd (%p443_p7), %s355_s25, 4294966272  ;;  %p18_p8 = scmp.ge.s32.totalorder %s634_s20, 4   ;;  %s814_s16 = smov %s567_s17 }
  0x72   : > { %s815_s17 = smov %s571_s18  ;;  %s816_s18 = smov %s646_s23 }
  0x73   : > { %s817_s19 = smov %s634_s20  ;;  %20 = sbr.rel (!%p18_p8) target bundleno = 8 (0x8), region = 77 }
  0x78   :  { %360 = vsyncpa [#allocation5], 1 }
  0x79   :  { %362 = vsyncpa [#allocation5 + $0x1], 1 }
  0x7a   :  { %363 = vsyncpa [#allocation6], 1 }
  0x7b   :  { %365 = vsyncpa [#allocation6 + $0x1], 1 }

</bundles_post_ra>
